<compile_context>
chip_gen: v7x
topology: tpu7x:2x2x1
jax: 0.10.0
libtpu: 0.0.40
codegen_flags: <defaults>
</compile_context>

<pallas_src>
import math
from functools import partial

import jax
import jax.numpy as jnp
from jax.experimental import pallas as pl
from jax.experimental.pallas import tpu as pltpu

N_HIDDEN = 256
OUT_PAD = 128  # lane-dense output width (value lives in the last column)


# ---------------------------------------------------------------------------
# Pallas kernel: one batch tile of the dueling-DQN trunk + heads.
# Emits head_out (TB, 128); the dueling combine happens in the XLA epilogue.
# ---------------------------------------------------------------------------
def _ndd_dqn_kernel(x_ref,
                    w1_ref, b1_ref,
                    w2_ref, b2_ref,
                    wh_ref, bh_ref,      # fused [value_hidden | advantage_hidden]
                    wo_ref, bo_ref,      # fused block-diagonal output projection
                    out_ref):
    # bf16 operands on the MXU, f32 accumulation; bias/ReLU in f32 on the VPU.
    x = x_ref[...].astype(jnp.bfloat16)                                    # (TB, D)

    # h1 = relu(x @ W1 + b1)
    h1 = jnp.dot(x, w1_ref[...], preferred_element_type=jnp.float32) + b1_ref[...]
    h1 = jnp.maximum(h1, 0.0).astype(jnp.bfloat16)                         # (TB, N)

    # h2 = relu(h1 @ W2 + b2)   (noisy weights folded outside)
    h2 = jnp.dot(h1, w2_ref[...], preferred_element_type=jnp.float32) + b2_ref[...]
    h2 = jnp.maximum(h2, 0.0).astype(jnp.bfloat16)                         # (TB, N)

    # Fused value/advantage hidden layers: one (TB,N) @ (N,2N) matmul.
    heads = jnp.dot(h2, wh_ref[...], preferred_element_type=jnp.float32) + bh_ref[...]
    # Cast to bf16 right after the ReLU: halves the largest live intermediate.
    heads = jnp.maximum(heads, 0.0).astype(jnp.bfloat16)                   # (TB, 2N)

    # Fused block-diagonal output projection: (2N, 128).
    #   columns [0, A)     -> advantages (advantage-hidden half)
    #   column  OUT_PAD-1  -> value      (value-hidden half)
    #   columns [A, 127)   -> exactly zero (zero weights + zero bias)
    out_ref[...] = (jnp.dot(heads, wo_ref[...], preferred_element_type=jnp.float32)
                    + bo_ref[...])                                         # (TB, 128)


# ---------------------------------------------------------------------------
# Wrapper: batch tiling, pallas_call, dueling epilogue, all under one jit.
# ---------------------------------------------------------------------------
def _pick_batch_tile(b):
    if b >= 256:
        return 256      # fills the 2x256 MXU M dim on v6e / v7x
    if b >= 128:
        return 128      # native v5e MXU M tile
    return max(8, ((b + 7) // 8) * 8)


@partial(jax.jit, static_argnames=("num_actions", "tile_b"))
def _forward_impl(x, w1, b1, w2, b2, wh, bh, wo, bo, *, num_actions, tile_b):
    b, d = x.shape
    n = w1.shape[1]
    bp = ((b + tile_b - 1) // tile_b) * tile_b
    if bp != b:
        x = jnp.pad(x, ((0, bp - b), (0, 0)))
    grid = (bp // tile_b,)

    flops = 2 * bp * (d * n + n * n + n * 2 * n + 2 * n * OUT_PAD)
    bytes_accessed = (bp * d * 4
                      + (w1.size + w2.size + wh.size + wo.size) * 2
                      + (b1.size + b2.size + bh.size + bo.size) * 4
                      + bp * OUT_PAD * 4)

    resident = lambda i: (0, 0)   # weights/biases: same block for every grid step
    head_out = pl.pallas_call(
        _ndd_dqn_kernel,
        out_shape=jax.ShapeDtypeStruct((bp, OUT_PAD), jnp.float32),
        grid=grid,
        in_specs=[
            pl.BlockSpec((tile_b, d), lambda i: (i, 0)),     # x streams per tile
            pl.BlockSpec((d, n), resident),
            pl.BlockSpec((1, n), resident),
            pl.BlockSpec((n, n), resident),
            pl.BlockSpec((1, n), resident),
            pl.BlockSpec((n, 2 * n), resident),
            pl.BlockSpec((1, 2 * n), resident),
            pl.BlockSpec((2 * n, OUT_PAD), resident),
            pl.BlockSpec((1, OUT_PAD), resident),
        ],
        out_specs=pl.BlockSpec((tile_b, OUT_PAD), lambda i: (i, 0)),
        compiler_params=pltpu.CompilerParams(
            dimension_semantics=("parallel",)),               # megacore on v7x
        cost_estimate=pl.CostEstimate(flops=int(flops), transcendentals=0,
                                      bytes_accessed=int(bytes_accessed)),
    )(x, w1, b1, w2, b2, wh, bh, wo, bo)

    # Dueling epilogue (torch: advantages.mean() over ALL B*A elements). Fused by
    # XLA inside this jit; padded rows are dropped before the mean.
    head_out = head_out[:b]
    advantages = head_out[:, :num_actions]
    values = head_out[:, OUT_PAD - 1:OUT_PAD]
    return advantages + (values - jnp.mean(advantages))


def ndd_dqn_forward(x, params):
    """x: (B, D) float32. params: fused bf16 weights + f32 biases (build_params)."""
    a = params["num_actions"]
    assert a <= OUT_PAD - 1, "fused output layout requires num_actions <= 127"
    tb = _pick_batch_tile(x.shape[0])
    return _forward_impl(x, params["w1"], params["b1"], params["w2"], params["b2"],
                         params["wh"], params["bh"], params["wo"], params["bo"],
                         num_actions=a, tile_b=tb)


# ---------------------------------------------------------------------------
# Deterministic parameter construction (mirrors the module's __init__).
# ---------------------------------------------------------------------------
def _scale_noise(key, size):
    x = jax.random.normal(key, (size,), dtype=jnp.float32)
    return jnp.sign(x) * jnp.sqrt(jnp.abs(x))


def make_noisy_linear(key, in_f, out_f, std_init=0.4):
    """Effective (weight, bias) in training mode: mu + sigma * eps."""
    k_wmu, k_bmu, k_ein, k_eout, k_beps = jax.random.split(key, 5)
    mu_range = 1.0 / math.sqrt(in_f)
    weight_mu = jax.random.uniform(k_wmu, (out_f, in_f), jnp.float32,
                                   minval=-mu_range, maxval=mu_range)
    bias_mu = jax.random.uniform(k_bmu, (out_f,), jnp.float32,
                                 minval=-mu_range, maxval=mu_range)
    weight_sigma = jnp.full((out_f, in_f), std_init / math.sqrt(in_f), jnp.float32)
    bias_sigma = jnp.full((out_f,), std_init / math.sqrt(out_f), jnp.float32)
    eps_in = _scale_noise(k_ein, in_f)
    eps_out = _scale_noise(k_eout, out_f)
    weight = weight_mu + weight_sigma * jnp.outer(eps_out, eps_in)
    bias = bias_mu + bias_sigma * _scale_noise(k_beps, out_f)
    return weight, bias


def make_linear(key, in_f, out_f):
    k_w, k_b = jax.random.split(key)
    bound = 1.0 / math.sqrt(in_f)
    weight = jax.random.uniform(k_w, (out_f, in_f), jnp.float32,
                                minval=-bound, maxval=bound)
    bias = jax.random.uniform(k_b, (out_f,), jnp.float32,
                              minval=-bound, maxval=bound)
    return weight, bias


def build_params(key, input_dim, num_actions, n=N_HIDDEN):
    assert num_actions <= OUT_PAD - 1, "fused output layout requires num_actions <= 127"
    keys = jax.random.split(key, 6)
    w1, b1 = make_linear(keys[0], input_dim, n)
    w2, b2 = make_noisy_linear(keys[1], n, n)
    wah, bah = make_noisy_linear(keys[2], n, n)
    wa, ba = make_noisy_linear(keys[3], n, num_actions)
    wvh, bvh = make_noisy_linear(keys[4], n, n)
    wv, bv = make_noisy_linear(keys[5], n, 1)

    def prep(w, b):
        # (in, out) layout, bf16 weights for the MXU, f32 bias kept 2D (1, out).
        return (jnp.asarray(w.T, jnp.bfloat16),
                jnp.asarray(b.reshape(1, -1), jnp.float32))

    p = {"num_actions": num_actions}
    p["w1"], p["b1"] = prep(w1, b1)
    p["w2"], p["b2"] = prep(w2, b2)
    wvh_t, bvh_r = prep(wvh, bvh)
    wah_t, bah_r = prep(wah, bah)
    wv_t, bv_r = prep(wv, bv)
    wa_t, ba_r = prep(wa, ba)

    # Fused hidden heads: [value_hidden | advantage_hidden] -> (n, 2n).
    p["wh"] = jnp.concatenate([wvh_t, wah_t], axis=1)
    p["bh"] = jnp.concatenate([bvh_r, bah_r], axis=1)

    # Fused block-diagonal output projection (2n, OUT_PAD):
    #   rows [0, n)   (value-hidden half)     -> column OUT_PAD-1 (value)
    #   rows [n, 2n)  (advantage-hidden half) -> columns [0, A)   (advantages)
    wo = jnp.zeros((2 * n, OUT_PAD), jnp.bfloat16)
    wo = wo.at[:n, OUT_PAD - 1].set(wv_t[:, 0])
    wo = wo.at[n:, :num_actions].set(wa_t)
    bo = jnp.zeros((1, OUT_PAD), jnp.float32)
    bo = bo.at[0, OUT_PAD - 1].set(bv_r[0, 0])
    bo = bo.at[0, :num_actions].set(ba_r[0])
    p["wo"] = wo
    p["bo"] = bo

    # Un-fused bf16 weights kept only for the reference check.
    p["_ref"] = {"wvh": wvh_t, "bvh": bvh_r, "wah": wah_t, "bah": bah_r,
                 "wv": wv_t, "bv": bv_r, "wa": wa_t, "ba": ba_r}
    return p


# ---------------------------------------------------------------------------
# JAX reference using the SAME bf16 weights / operand casts (un-fused layout).
# ---------------------------------------------------------------------------
def _mm(a_f32, w_bf16):
    return jnp.dot(a_f32.astype(jnp.bfloat16), w_bf16,
                   preferred_element_type=jnp.float32)


def reference_forward(x, p):
    r = p["_ref"]
    h1 = jnp.maximum(_mm(x, p["w1"]) + p["b1"], 0.0)
    h2 = jnp.maximum(_mm(h1, p["w2"]) + p["b2"], 0.0)
    vh = jnp.maximum(_mm(h2, r["wvh"]) + r["bvh"], 0.0)
    values = _mm(vh, r["wv"]) + r["bv"]
    ah = jnp.maximum(_mm(h2, r["wah"]) + r["bah"], 0.0)
    adv = _mm(ah, r["wa"]) + r["ba"]
    return values + (adv - jnp.mean(adv))


# TODO(synk): per-call noise resampling (reset_noise) happens outside the kernel;
# effective weights (mu + sigma * eps) are folded in before the forward pass.

if __name__ == "__main__":
    B, D, A = 10, 24, 5          # batch, input_dim[0], num_actions (small demo sizes)
    key = jax.random.PRNGKey(0)
    k_params, k_x = jax.random.split(key)

    params = build_params(k_params, D, A)
    x = jax.random.normal(k_x, (B, D), dtype=jnp.float32)

    q = ndd_dqn_forward(x, params)
    q = jax.block_until_ready(q)

    q_ref = reference_forward(x, params)
    assert q.shape == (B, A)
    assert jnp.allclose(q, q_ref, atol=1e-2, rtol=1e-2), "mismatch vs JAX reference"

    print("KERNEL_OK")
</pallas_src>

<mosaic_0001>
module attributes {stable_mosaic.version = 11 : i64} {
  func.func @_ndd_dqn_kernel(%arg0: i32, %arg1: memref<16x24xf32, #tpu.memory_space<vmem>>, %arg2: memref<24x256xbf16, #tpu.memory_space<vmem>>, %arg3: memref<1x256xf32, #tpu.memory_space<vmem>>, %arg4: memref<256x256xbf16, #tpu.memory_space<vmem>>, %arg5: memref<1x256xf32, #tpu.memory_space<vmem>>, %arg6: memref<256x512xbf16, #tpu.memory_space<vmem>>, %arg7: memref<1x512xf32, #tpu.memory_space<vmem>>, %arg8: memref<512x128xbf16, #tpu.memory_space<vmem>>, %arg9: memref<1x128xf32, #tpu.memory_space<vmem>>, %arg10: memref<16x128xf32, #tpu.memory_space<vmem>>) attributes {dimension_semantics = [#tpu.dimension_semantics<parallel>], iteration_bounds = array<i64: 1>, scalar_prefetch = 0 : i64, scratch_operands = 0 : i64, tpu.core_type = #tpu.core_type<tc>, window_params = [{transform_indices = @transform_0, window_bounds = array<i64: 16, 24>}, {pipeline_mode = #tpu.pipeline_mode<synchronous>, transform_indices = @transform_1, window_bounds = array<i64: 24, 256>}, {pipeline_mode = #tpu.pipeline_mode<synchronous>, transform_indices = @transform_2, window_bounds = array<i64: 1, 256>}, {pipeline_mode = #tpu.pipeline_mode<synchronous>, transform_indices = @transform_3, window_bounds = array<i64: 256, 256>}, {pipeline_mode = #tpu.pipeline_mode<synchronous>, transform_indices = @transform_4, window_bounds = array<i64: 1, 256>}, {pipeline_mode = #tpu.pipeline_mode<synchronous>, transform_indices = @transform_5, window_bounds = array<i64: 256, 512>}, {pipeline_mode = #tpu.pipeline_mode<synchronous>, transform_indices = @transform_6, window_bounds = array<i64: 1, 512>}, {pipeline_mode = #tpu.pipeline_mode<synchronous>, transform_indices = @transform_7, window_bounds = array<i64: 512, 128>}, {pipeline_mode = #tpu.pipeline_mode<synchronous>, transform_indices = @transform_8, window_bounds = array<i64: 1, 128>}, {transform_indices = @transform_9, window_bounds = array<i64: 16, 128>}]} {
    %c0 = arith.constant 0 : index
    %c0_0 = arith.constant 0 : index
    %0 = vector.load %arg1[%c0, %c0_0] : memref<16x24xf32, #tpu.memory_space<vmem>>, vector<16x24xf32>
    %1 = arith.truncf %0 : vector<16x24xf32> to vector<16x24xbf16>
    %c0_1 = arith.constant 0 : index
    %c0_2 = arith.constant 0 : index
    %2 = vector.load %arg2[%c0_1, %c0_2] : memref<24x256xbf16, #tpu.memory_space<vmem>>, vector<24x256xbf16>
    %cst = arith.constant dense<0.000000e+00> : vector<16x256xf32>
    %3 = tpu.matmul %1, %2, %cst {dimension_numbers = #tpu.dot_dimension_numbers<[1], [0], [0], [1], [0, 0, 1, 1], [], []>} : vector<16x24xbf16>, vector<24x256xbf16>, vector<16x256xf32> -> vector<16x256xf32>
    %c0_3 = arith.constant 0 : index
    %c0_4 = arith.constant 0 : index
    %4 = vector.load %arg3[%c0_3, %c0_4] : memref<1x256xf32, #tpu.memory_space<vmem>>, vector<1x256xf32>
    %5 = vector.broadcast %4 : vector<1x256xf32> to vector<16x256xf32>
    %6 = arith.addf %3, %5 : vector<16x256xf32>
    %cst_5 = arith.constant 0.000000e+00 : f32
    %7 = vector.broadcast %cst_5 : f32 to vector<16x256xf32>
    %8 = arith.maximumf %6, %7 : vector<16x256xf32>
    %9 = arith.truncf %8 : vector<16x256xf32> to vector<16x256xbf16>
    %c0_6 = arith.constant 0 : index
    %c0_7 = arith.constant 0 : index
    %10 = vector.load %arg4[%c0_6, %c0_7] : memref<256x256xbf16, #tpu.memory_space<vmem>>, vector<256x256xbf16>
    %cst_8 = arith.constant dense<0.000000e+00> : vector<16x256xf32>
    %11 = tpu.matmul %9, %10, %cst_8 {dimension_numbers = #tpu.dot_dimension_numbers<[1], [0], [0], [1], [0, 0, 1, 1], [], []>} : vector<16x256xbf16>, vector<256x256xbf16>, vector<16x256xf32> -> vector<16x256xf32>
    %c0_9 = arith.constant 0 : index
    %c0_10 = arith.constant 0 : index
    %12 = vector.load %arg5[%c0_9, %c0_10] : memref<1x256xf32, #tpu.memory_space<vmem>>, vector<1x256xf32>
    %13 = vector.broadcast %12 : vector<1x256xf32> to vector<16x256xf32>
    %14 = arith.addf %11, %13 : vector<16x256xf32>
    %cst_11 = arith.constant 0.000000e+00 : f32
    %15 = vector.broadcast %cst_11 : f32 to vector<16x256xf32>
    %16 = arith.maximumf %14, %15 : vector<16x256xf32>
    %17 = arith.truncf %16 : vector<16x256xf32> to vector<16x256xbf16>
    %c0_12 = arith.constant 0 : index
    %c0_13 = arith.constant 0 : index
    %18 = vector.load %arg6[%c0_12, %c0_13] : memref<256x512xbf16, #tpu.memory_space<vmem>>, vector<256x512xbf16>
    %cst_14 = arith.constant dense<0.000000e+00> : vector<16x512xf32>
    %19 = tpu.matmul %17, %18, %cst_14 {dimension_numbers = #tpu.dot_dimension_numbers<[1], [0], [0], [1], [0, 0, 1, 1], [], []>} : vector<16x256xbf16>, vector<256x512xbf16>, vector<16x512xf32> -> vector<16x512xf32>
    %c0_15 = arith.constant 0 : index
    %c0_16 = arith.constant 0 : index
    %20 = vector.load %arg7[%c0_15, %c0_16] : memref<1x512xf32, #tpu.memory_space<vmem>>, vector<1x512xf32>
    %21 = vector.broadcast %20 : vector<1x512xf32> to vector<16x512xf32>
    %22 = arith.addf %19, %21 : vector<16x512xf32>
    %cst_17 = arith.constant 0.000000e+00 : f32
    %23 = vector.broadcast %cst_17 : f32 to vector<16x512xf32>
    %24 = arith.maximumf %22, %23 : vector<16x512xf32>
    %25 = arith.truncf %24 : vector<16x512xf32> to vector<16x512xbf16>
    %c0_18 = arith.constant 0 : index
    %c0_19 = arith.constant 0 : index
    %26 = vector.load %arg8[%c0_18, %c0_19] : memref<512x128xbf16, #tpu.memory_space<vmem>>, vector<512x128xbf16>
    %cst_20 = arith.constant dense<0.000000e+00> : vector<16x128xf32>
    %27 = tpu.matmul %25, %26, %cst_20 {dimension_numbers = #tpu.dot_dimension_numbers<[1], [0], [0], [1], [0, 0, 1, 1], [], []>} : vector<16x512xbf16>, vector<512x128xbf16>, vector<16x128xf32> -> vector<16x128xf32>
    %c0_21 = arith.constant 0 : index
    %c0_22 = arith.constant 0 : index
    %28 = vector.load %arg9[%c0_21, %c0_22] : memref<1x128xf32, #tpu.memory_space<vmem>>, vector<1x128xf32>
    %29 = vector.broadcast %28 : vector<1x128xf32> to vector<16x128xf32>
    %30 = arith.addf %27, %29 : vector<16x128xf32>
    %c0_23 = arith.constant 0 : index
    %c0_24 = arith.constant 0 : index
    %31 = vector.load %arg10[%c0_23, %c0_24] : memref<16x128xf32, #tpu.memory_space<vmem>>, vector<16x128xf32>
    tpu.vector_store %arg10[%c0_23, %c0_24], %30 {strides = array<i32>} : memref<16x128xf32, #tpu.memory_space<vmem>>, vector<16x128xf32>,
    return
  }
  func.func @transform_0(%arg0: i32) -> (i32, i32) {
    %c0_i32 = arith.constant 0 : i32
    %c0_i32_0 = arith.constant 0 : i32
    return %arg0, %c0_i32 : i32, i32
  }
  func.func @transform_1(%arg0: i32) -> (i32, i32) {
    %c0_i32 = arith.constant 0 : i32
    %c0_i32_0 = arith.constant 0 : i32
    %c0_i32_1 = arith.constant 0 : i32
    return %c0_i32, %c0_i32_0 : i32, i32
  }
  func.func @transform_2(%arg0: i32) -> (i32, i32) {
    %c0_i32 = arith.constant 0 : i32
    %c0_i32_0 = arith.constant 0 : i32
    %c0_i32_1 = arith.constant 0 : i32
    return %c0_i32, %c0_i32_0 : i32, i32
  }
  func.func @transform_3(%arg0: i32) -> (i32, i32) {
    %c0_i32 = arith.constant 0 : i32
    %c0_i32_0 = arith.constant 0 : i32
    %c0_i32_1 = arith.constant 0 : i32
    return %c0_i32, %c0_i32_0 : i32, i32
  }
  func.func @transform_4(%arg0: i32) -> (i32, i32) {
    %c0_i32 = arith.constant 0 : i32
    %c0_i32_0 = arith.constant 0 : i32
    %c0_i32_1 = arith.constant 0 : i32
    return %c0_i32, %c0_i32_0 : i32, i32
  }
  func.func @transform_5(%arg0: i32) -> (i32, i32) {
    %c0_i32 = arith.constant 0 : i32
    %c0_i32_0 = arith.constant 0 : i32
    %c0_i32_1 = arith.constant 0 : i32
    return %c0_i32, %c0_i32_0 : i32, i32
  }
  func.func @transform_6(%arg0: i32) -> (i32, i32) {
    %c0_i32 = arith.constant 0 : i32
    %c0_i32_0 = arith.constant 0 : i32
    %c0_i32_1 = arith.constant 0 : i32
    return %c0_i32, %c0_i32_0 : i32, i32
  }
  func.func @transform_7(%arg0: i32) -> (i32, i32) {
    %c0_i32 = arith.constant 0 : i32
    %c0_i32_0 = arith.constant 0 : i32
    %c0_i32_1 = arith.constant 0 : i32
    return %c0_i32, %c0_i32_0 : i32, i32
  }
  func.func @transform_8(%arg0: i32) -> (i32, i32) {
    %c0_i32 = arith.constant 0 : i32
    %c0_i32_0 = arith.constant 0 : i32
    %c0_i32_1 = arith.constant 0 : i32
    return %c0_i32, %c0_i32_0 : i32, i32
  }
  func.func @transform_9(%arg0: i32) -> (i32, i32) {
    %c0_i32 = arith.constant 0 : i32
    %c0_i32_0 = arith.constant 0 : i32
    return %arg0, %c0_i32 : i32, i32
  }
}

</mosaic_0001>

<bundles_post_ra>
// kernel: _forward_impl.1
= control target key start
LH: loop header
LB: loop body
LE: loop exit
PB: predicated region body
PF: predicated region fallthrough
CT: control target
= control target key end

     0   :  { %14 = vsyncpa [#allocation3], 0  ;;  %s1862_s0 = inlined_call_operand.vmem [shape: f32[16,24], index: 0, kind: input, shape index: {}]   ;;  %s1863_s1 = inlined_call_operand.vmem [shape: bf16[24,256], index: 1, kind: input, shape index: {}]   ;;  %s1864_s2 = inlined_call_operand.vmem [shape: f32[1,256], index: 2, kind: input, shape index: {}]   ;;  %s1865_s3 = inlined_call_operand.hbm [shape: bf16[256,256], index: 3, kind: input, shape index: {}]   ;;  %s1866_s4 = inlined_call_operand.vmem [shape: f32[1,256], index: 4, kind: input, shape index: {}]   ;;  %s1867_s5 = inlined_call_operand.hbm [shape: bf16[256,512], index: 5, kind: input, shape index: {}]   ;;  %s1868_s6 = inlined_call_operand.vmem [shape: f32[1,512], index: 6, kind: input, shape index: {}]   ;;  %s1869_s7 = inlined_call_operand.hbm [shape: bf16[512,128], index: 7, kind: input, shape index: {}]   ;;  %s1870_s8 = inlined_call_operand.vmem [shape: f32[1,128], index: 8, kind: input, shape index: {}]   ;;  %s1871_s9 = inlined_call_operand.vmem [shape: f32[16,128], index: 9, kind: output, shape index: {}]  }
   0x1   :  { %15 = vsyncpa [#allocation5], 0  ;;  %s1717_s30 = smov [#allocation4]   ;;  %s1647_s13 = scalar_lea.hbm %s1867_s5, 8192 }
   0x2   :  { %s41_s10 = sshll.u32 %s1717_s30, 4  ;;  %p1648_p0 = scmp.ne.s32.totalorder %s1867_s5, %s1647_s13  ;;  %s42_s10 = int_to_ptr.vmem [resolvable:$true] %s41_s10 }
   0x3   :  { %p1651_p1 = scmp.lt.u32.totalorder %s1647_s13, %s1867_s5 }
   0x5   :  { %p1653_p2 = pnand %p1651_p1, %p1648_p0 }
   0x7   :  { %1656 = shalt.err (!%p1653_p2)
}
   0x8   :  { %s1657_s18 = scalar_lea.vmem %s42_s10, 8192  ;;  %p1662_p4 = scmp.lt.s32.totalorder %s42_s10, %s42_s10 }
   0x9   :  { %p1658_p3 = scmp.ne.s32.totalorder %s42_s10, %s1657_s18  ;;  %p1663_p5 = scmp.lt.s32.totalorder %s1657_s18, %s1657_s18 }
   0xb   :  { %p1664_p6 = por %p1663_p5, %p1662_p4 }
   0xd   :  { %p1665_p7 = pnand %p1664_p6, %p1658_p3 }
   0xf   :  { %1668 = shalt.err (!%p1665_p7)
}
  0x10   :  { %s1718_s19 = smov 256   ;;  %s1719_s20 = smov 16  }
  0x11   :  { %47 = dma.hbm_to_vmem [thread:$0]  %s1867_s5, 8192, %s42_s10, [#allocation5], %s1718_s19, %s1718_s19, %s1719_s20  }
  0x12   :  { %s1720_s23 = smov [#allocation2]   ;;  %s1669_s27 = scalar_lea.hbm %s1865_s3, 4096 }
  0x13   :  { %s27_s24 = sshll.u32 %s1720_s23, 4  ;;  %p1670_p8 = scmp.ne.s32.totalorder %s1865_s3, %s1669_s27  ;;  %s28_s24 = int_to_ptr.vmem [resolvable:$true] %s27_s24 }
  0x14   :  { %p1673_p9 = scmp.lt.u32.totalorder %s1669_s27, %s1865_s3 }
  0x16   :  { %p1675_p10 = pnand %p1673_p9, %p1670_p8 }
  0x18   :  { %1678 = shalt.err (!%p1675_p10)
}
  0x19   :  { %s1679_s12 = scalar_lea.vmem %s28_s24, 4096  ;;  %p1684_p12 = scmp.lt.s32.totalorder %s28_s24, %s28_s24 }
  0x1a   :  { %p1680_p11 = scmp.ne.s32.totalorder %s28_s24, %s1679_s12  ;;  %p1685_p13 = scmp.lt.s32.totalorder %s1679_s12, %s1679_s12 }
  0x1c   :  { %p1686_p0 = por %p1685_p13, %p1684_p12 }
  0x1e   :  { %p1687_p1 = pnand %p1686_p0, %p1680_p11 }
  0x20   :  { %1690 = shalt.err (!%p1687_p1)
}
  0x21   :  { %s1721_s5 = smov 128   ;;  %s1722_s10 = smov 8  }
  0x22   :  { %33 = dma.hbm_to_vmem [thread:$0]  %s1865_s3, 4096, %s28_s24, [#allocation3], %s1721_s5, %s1721_s5, %s1722_s10  }
  0x23   :  { %s1723_s15 = smov [#allocation6]   ;;  %s1691_s19 = scalar_lea.hbm %s1869_s7, 4096 }
  0x24   :  { %s55_s16 = sshll.u32 %s1723_s15, 4  ;;  %p1692_p2 = scmp.ne.s32.totalorder %s1869_s7, %s1691_s19  ;;  %s56_s16 = int_to_ptr.vmem [resolvable:$true] %s55_s16 }
  0x25   :  { %p1695_p3 = scmp.lt.u32.totalorder %s1691_s19, %s1869_s7 }
  0x27   :  { %p1697_p4 = pnand %p1695_p3, %p1692_p2 }
  0x29   :  { %1700 = shalt.err (!%p1697_p4)
}
  0x2a   :  { %s1701_s25 = scalar_lea.vmem %s56_s16, 4096  ;;  %p1706_p6 = scmp.lt.s32.totalorder %s56_s16, %s56_s16 }
  0x2b   :  { %p1702_p5 = scmp.ne.s32.totalorder %s56_s16, %s1701_s25  ;;  %p1707_p7 = scmp.lt.s32.totalorder %s1701_s25, %s1701_s25 }
  0x2d   :  { %p1708_p8 = por %p1707_p7, %p1706_p6 }
  0x2f   :  { %p1709_p9 = pnand %p1708_p8, %p1702_p5 }
  0x31   :  { %1712 = shalt.err (!%p1709_p9)
}
  0x32   :  { %s1724_s3 = smov 64   ;;  %s1725_s24 = smov 4  }
  0x33   :  { %61 = dma.hbm_to_vmem [thread:$0]  %s1869_s7, 4096, %s56_s16, [#allocation5], %s1724_s3, %s1724_s3, %s1725_s24  }
  0x34   :  { %1713 = dma.done.wait [#allocation3], 4096  }
  0x35   :  { %1714 = vsyncadd [#allocation3], 4294963200 }
  0x36   :  { %1715 = dma.done.wait [#allocation5], 12288  }
  0x37   :  { %1716 = vsyncadd [#allocation5], 4294955008  ;;  %v1726_v0 = vmov 0   ;;  %v1466_v1 = vld [vmem:[%s1863_s1 + $0x4] ss:$8 sps:$4 sm:$0xff]   ;;  %v79_v3 = vld [vmem:[%s1863_s1 + $0x10] sm:$0xff] }
  0x38   :  { %150 = vmatprep.mubr.bf16.mxu0 %v1726_v0  ;;  %v1468_v2 = vld [vmem:[%s1863_s1] ss:$8 sps:$4 sm:$0xff]   ;;  %vm111_vm0 = vcmask 1043456   ;;  %118 = vmatprep.subr.bf16.mxu0 %v1466_v1  ;;  %v1280_v5 = vcombine.high %v79_v3, %v79_v3  ;;  %v1279_v6 = vcombine.low %v79_v3, %v79_v3  ;;  %v1471_v8 = vld [vmem:[#allocation2 + $0x4] ss:$8 sps:$4 sm:$0xff]   ;;  %vm107_vm1 = vcmask 195584  }
  0x39   :  { %v74_v4 = vld [vmem:[%s1862_s0] sm:$0xff]  ;;  %v75_v7 = vld [vmem:[%s1862_s0 + $0x8] sm:$0xff]  ;;  %119 = vmatpush1.bf16.msra.mxu0 %v1468_v2  ;;  %v1473_v9 = vld [vmem:[#allocation2] ss:$8 sps:$4 sm:$0xff]   ;;  %371 = vmatprep.subr.bf16.mxu1 %v1471_v8 }
  0x3a   :  { %1281 = vmatprep.subr.msk.bf16.mxu0 %vm111_vm0, %v1280_v5  ;;  %v113_v10 = vsel %vm111_vm0, %v1279_v6, 0  ;;  %v1474_v11 = vld [vmem:[#allocation2 + $0x14] ss:$8 sps:$4 sm:$0xff]   ;;  %v76_v12 = vpack.c.bf16 %v75_v7, %v74_v4  ;;  %372 = vmatpush1.bf16.msra.mxu1 %v1473_v9  ;;  %v1476_v13 = vld [vmem:[#allocation2 + $0x10] ss:$8 sps:$4 sm:$0xff]   ;;  %v82_v7 = vlaneseq }
  0x3b   :  { %373 = vmatprep.subr.bf16.mxu1 %v1474_v11  ;;  %v1477_v14 = vld [vmem:[#allocation2 + $0x24] ss:$8 sps:$4 sm:$0xff]   ;;  %v1479_v15 = vld [vmem:[#allocation2 + $0x20] ss:$8 sps:$4 sm:$0xff]   ;;  %v1480_v16 = vld [vmem:[#allocation2 + $0x34] ss:$8 sps:$4 sm:$0xff]  }
  0x3c   :  { %v1482_v17 = vld [vmem:[#allocation2 + $0x30] ss:$8 sps:$4 sm:$0xff]   ;;  %v1483_v18 = vld [vmem:[#allocation2 + $0x44] ss:$8 sps:$4 sm:$0xff]   ;;  %v1485_v19 = vld [vmem:[#allocation2 + $0x40] ss:$8 sps:$4 sm:$0xff]  }
  0x3d   :  { %121 = vmatpush1.bf16.msra.mxu0 %v113_v10  ;;  %v1486_v20 = vld [vmem:[#allocation2 + $0x54] ss:$8 sps:$4 sm:$0xff]   ;;  %v1488_v21 = vld [vmem:[#allocation2 + $0x50] ss:$8 sps:$4 sm:$0xff]   ;;  %v1489_v22 = vld [vmem:[#allocation2 + $0x64] ss:$8 sps:$4 sm:$0xff]  }
  0x3e   :  { %374 = vmatpush1.bf16.msra.mxu1 %v1476_v13  ;;  %v1491_v23 = vld [vmem:[#allocation2 + $0x60] ss:$8 sps:$4 sm:$0xff]   ;;  %v1492_v24 = vld [vmem:[#allocation2 + $0x74] ss:$8 sps:$4 sm:$0xff]   ;;  %v1494_v25 = vld [vmem:[#allocation2 + $0x70] ss:$8 sps:$4 sm:$0xff]  }
  0x3f   :  { %375 = vmatprep.subr.bf16.mxu1 %v1477_v14  ;;  %v1495_v26 = vld [vmem:[#allocation2 + $0x84] ss:$8 sps:$4 sm:$0xff]   ;;  %v1497_v27 = vld [vmem:[#allocation2 + $0x80] ss:$8 sps:$4 sm:$0xff]   ;;  %v1498_v28 = vld [vmem:[#allocation2 + $0x94] ss:$8 sps:$4 sm:$0xff]  }
  0x40   :  { %1282 = vmatmul.mubr.msk.bf16.vlgmr.msra.gmra.mrb[0].mxu0 %vm107_vm1, %v76_v12  ;;  %v1500_v29 = vld [vmem:[#allocation2 + $0x90] ss:$8 sps:$4 sm:$0xff]   ;;  %v1501_v30 = vld [vmem:[#allocation2 + $0xa4] ss:$8 sps:$4 sm:$0xff]   ;;  %v1503_v31 = vld [vmem:[#allocation2 + $0xa0] ss:$8 sps:$4 sm:$0xff]  }
  0x41   :  { %v1504_v32 = vld [vmem:[#allocation2 + $0xb4] ss:$8 sps:$4 sm:$0xff]   ;;  %v1506_v33 = vld [vmem:[#allocation2 + $0xb0] ss:$8 sps:$4 sm:$0xff]   ;;  %v1507_v34 = vld [vmem:[#allocation2 + $0xc4] ss:$8 sps:$4 sm:$0xff]  }
  0x42   :  { %376 = vmatpush1.bf16.msra.mxu1 %v1479_v15  ;;  %v1509_v35 = vld [vmem:[#allocation2 + $0xc0] ss:$8 sps:$4 sm:$0xff]   ;;  %v1510_v36 = vld [vmem:[#allocation2 + $0xd4] ss:$8 sps:$4 sm:$0xff]   ;;  %v1512_v37 = vld [vmem:[#allocation2 + $0xd0] ss:$8 sps:$4 sm:$0xff]  }
  0x43   :  { %377 = vmatprep.subr.bf16.mxu1 %v1480_v16  ;;  %v1513_v38 = vld [vmem:[#allocation2 + $0xe4] ss:$8 sps:$4 sm:$0xff]   ;;  %v1515_v39 = vld [vmem:[#allocation2 + $0xe0] ss:$8 sps:$4 sm:$0xff]   ;;  %v1516_v40 = vld [vmem:[#allocation2 + $0xf4] ss:$8 sps:$4 sm:$0xff]  }
  0x44   :  { %v1518_v41 = vld [vmem:[#allocation2 + $0xf0] ss:$8 sps:$4 sm:$0xff]   ;;  %v1521_v43 = vld [vmem:[#allocation4 + $0x4] ss:$16 sps:$4 sm:$0xff]   ;;  %v1524_v44 = vld [vmem:[#allocation4 + $0xc] ss:$16 sps:$4 sm:$0xff]  }
  0x45   :  { %v1519_v42 = vld [vmem:[#allocation4] ss:$16 sps:$4 sm:$0xff]   ;;  %v1527_v45 = vld [vmem:[#allocation4 + $0x24] ss:$16 sps:$4 sm:$0xff]   ;;  %826 = vmatprep.subr.bf16.mxu0 %v1521_v43  ;;  %v1828_v8 = vshrl.u32 %v82_v7, 7 }
  0x46   :  { %378 = vmatpush1.bf16.msra.mxu1 %v1482_v17  ;;  %827 = vmatpush1.bf16.msra.mxu0 %v1519_v42  ;;  %v1525_v46 = vld [vmem:[#allocation4 + $0x20] ss:$16 sps:$4 sm:$0xff]   ;;  %v1533_v47 = vld [vmem:[#allocation4 + $0x44] ss:$16 sps:$4 sm:$0xff]   ;;  %v1564_v42 = vld [vmem:[#allocation4 + $0xe8] ss:$16 sps:$4 sm:$0xff]  }
  0x47   :  { %379 = vmatprep.subr.bf16.mxu1 %v1483_v18  ;;  %828 = vmatprep.subr.bf16.mxu0 %v1527_v45  ;;  %v1531_v48 = vld [vmem:[#allocation4 + $0x40] ss:$16 sps:$4 sm:$0xff]   ;;  %v1539_v49 = vld [vmem:[#allocation4 + $0x64] ss:$16 sps:$4 sm:$0xff]   ;;  %v1831_v9 = vsub.s32 0, %v1828_v8  ;;  %v1837_v11 = vsub.s32 1, %v1828_v8 }
  0x48   :  { %v1537_v50 = vld [vmem:[#allocation4 + $0x60] ss:$16 sps:$4 sm:$0xff]   ;;  %v1545_v51 = vld [vmem:[#allocation4 + $0x84] ss:$16 sps:$4 sm:$0xff]   ;;  %v1572_v43 = vld [vmem:[#allocation4 + $0x10c] ss:$16 sps:$4 sm:$0xff]  }
  0x49   :  { %v1543_v52 = vld [vmem:[#allocation4 + $0x80] ss:$16 sps:$4 sm:$0xff]   ;;  %v1551_v53 = vld [vmem:[#allocation4 + $0xa4] ss:$16 sps:$4 sm:$0xff]   ;;  %v1578_v45 = vld [vmem:[#allocation4 + $0x12c] ss:$16 sps:$4 sm:$0xff]  }
  0x4a   :  { %380 = vmatpush1.bf16.msra.mxu1 %v1485_v19  ;;  %829 = vmatpush1.bf16.msra.mxu0 %v1525_v46  ;;  %v1549_v54 = vld [vmem:[#allocation4 + $0xa0] ss:$16 sps:$4 sm:$0xff]   ;;  %v1557_v55 = vld [vmem:[#allocation4 + $0xc4] ss:$16 sps:$4 sm:$0xff]   ;;  %v1576_v46 = vld [vmem:[#allocation4 + $0x128] ss:$16 sps:$4 sm:$0xff]  }
  0x4b   :  { %381 = vmatprep.subr.bf16.mxu1 %v1486_v20  ;;  %830 = vmatprep.subr.bf16.mxu0 %v1533_v47  ;;  %v1555_v56 = vld [vmem:[#allocation4 + $0xc0] ss:$16 sps:$4 sm:$0xff]   ;;  %v1563_v57 = vld [vmem:[#allocation4 + $0xe4] ss:$16 sps:$4 sm:$0xff]   ;;  %v1584_v47 = vld [vmem:[#allocation4 + $0x14c] ss:$16 sps:$4 sm:$0xff]  }
  0x4c   :  { %v1561_v58 = vld [vmem:[#allocation4 + $0xe0] ss:$16 sps:$4 sm:$0xff]   ;;  %v1569_v59 = vld [vmem:[#allocation4 + $0x104] ss:$16 sps:$4 sm:$0xff]  }
  0x4d   :  { %v1567_v60 = vld [vmem:[#allocation4 + $0x100] ss:$16 sps:$4 sm:$0xff]   ;;  %v1575_v61 = vld [vmem:[#allocation4 + $0x124] ss:$16 sps:$4 sm:$0xff]  }
  0x4e   :  { %382 = vmatpush1.bf16.msra.mxu1 %v1488_v21  ;;  %831 = vmatpush1.bf16.msra.mxu0 %v1531_v48  ;;  %v1573_v62 = vld [vmem:[#allocation4 + $0x120] ss:$16 sps:$4 sm:$0xff]   ;;  %v1581_v63 = vld [vmem:[#allocation4 + $0x144] ss:$16 sps:$4 sm:$0xff]   ;;  %v1582_v48 = vld [vmem:[#allocation4 + $0x148] ss:$16 sps:$4 sm:$0xff]  }
  0x4f   :  { %383 = vmatprep.subr.bf16.mxu1 %v1489_v22  ;;  %832 = vmatprep.subr.bf16.mxu0 %v1539_v49  ;;  %v1579_v0 = vld [vmem:[#allocation4 + $0x140] ss:$16 sps:$4 sm:$0xff]   ;;  %v1587_v1 = vld [vmem:[#allocation4 + $0x164] ss:$16 sps:$4 sm:$0xff]   ;;  %v1590_v49 = vld [vmem:[#allocation4 + $0x16c] ss:$16 sps:$4 sm:$0xff]  }
  0x50   :  { %v1585_v2 = vld [vmem:[#allocation4 + $0x160] ss:$16 sps:$4 sm:$0xff]   ;;  %v1593_v3 = vld [vmem:[#allocation4 + $0x184] ss:$16 sps:$4 sm:$0xff]  }
  0x51   :  { %v1591_v4 = vld [vmem:[#allocation4 + $0x180] ss:$16 sps:$4 sm:$0xff]   ;;  %v1599_v5 = vld [vmem:[#allocation4 + $0x1a4] ss:$16 sps:$4 sm:$0xff]  }
  0x52   :  { %384 = vmatpush1.bf16.msra.mxu1 %v1491_v23  ;;  %833 = vmatpush1.bf16.msra.mxu0 %v1537_v50  ;;  %v1597_v6 = vld [vmem:[#allocation4 + $0x1a0] ss:$16 sps:$4 sm:$0xff]   ;;  %v1588_v50 = vld [vmem:[#allocation4 + $0x168] ss:$16 sps:$4 sm:$0xff]  }
  0x53   :  { %385 = vmatprep.subr.bf16.mxu1 %v1492_v24  ;;  %834 = vmatprep.subr.bf16.mxu0 %v1545_v51  ;;  %v80_v10 = vld [vmem:[%s1864_s2] sm:$0x3]  ;;  %v1596_v51 = vld [vmem:[#allocation4 + $0x18c] ss:$16 sps:$4 sm:$0xff]  }
  0x54   :  { %v85_v12 = vrot.slane %v80_v10, %v1831_v9  ;;  %v89_v13 = vrot.slane %v80_v10, %v1837_v11 }
  0x56   :  { %386 = vmatpush1.bf16.msra.mxu1 %v1494_v25  ;;  %835 = vmatpush1.bf16.msra.mxu0 %v1543_v52  ;;  %v1594_v52 = vld [vmem:[#allocation4 + $0x188] ss:$16 sps:$4 sm:$0xff]  }
  0x57   :  { %387 = vmatprep.subr.bf16.mxu1 %v1495_v26  ;;  %836 = vmatprep.subr.bf16.mxu0 %v1551_v53  ;;  %v1602_v53 = vld [vmem:[#allocation4 + $0x1ac] ss:$16 sps:$4 sm:$0xff]  }
  0x5a   :  { %388 = vmatpush1.bf16.msra.mxu1 %v1497_v27  ;;  %837 = vmatpush1.bf16.msra.mxu0 %v1549_v54  ;;  %v1600_v54 = vld [vmem:[#allocation4 + $0x1a8] ss:$16 sps:$4 sm:$0xff]  }
  0x5b   :  { %389 = vmatprep.subr.bf16.mxu1 %v1498_v28  ;;  %838 = vmatprep.subr.bf16.mxu0 %v1557_v55  ;;  %v1522_v28 = vld [vmem:[#allocation4 + $0x8] ss:$16 sps:$4 sm:$0xff]   ;;  %v1605_v55 = vld [vmem:[#allocation4 + $0x1c4] ss:$16 sps:$4 sm:$0xff]  }
  0x5e   :  { %390 = vmatpush1.bf16.msra.mxu1 %v1500_v29  ;;  %839 = vmatpush1.bf16.msra.mxu0 %v1555_v56  ;;  %v1530_v29 = vld [vmem:[#allocation4 + $0x2c] ss:$16 sps:$4 sm:$0xff]  }
  0x5f   :  { %391 = vmatprep.subr.bf16.mxu1 %v1501_v30  ;;  %840 = vmatprep.subr.bf16.mxu0 %v1563_v57  ;;  %v1528_v30 = vld [vmem:[#allocation4 + $0x28] ss:$16 sps:$4 sm:$0xff]   ;;  %v1608_v56 = vld [vmem:[#allocation4 + $0x1cc] ss:$16 sps:$4 sm:$0xff]   ;;  %v1603_v57 = vld [vmem:[#allocation4 + $0x1c0] ss:$16 sps:$4 sm:$0xff]  }
  0x62   :  { %392 = vmatpush1.bf16.msra.mxu1 %v1503_v31  ;;  %841 = vmatpush1.bf16.msra.mxu0 %v1561_v58  ;;  %v1536_v31 = vld [vmem:[#allocation4 + $0x4c] ss:$16 sps:$4 sm:$0xff]   ;;  %v1606_v58 = vld [vmem:[#allocation4 + $0x1c8] ss:$16 sps:$4 sm:$0xff]  }
  0x63   :  { %393 = vmatprep.subr.bf16.mxu1 %v1504_v32  ;;  %842 = vmatprep.subr.bf16.mxu0 %v1569_v59  ;;  %v1534_v32 = vld [vmem:[#allocation4 + $0x48] ss:$16 sps:$4 sm:$0xff]   ;;  %v1611_v59 = vld [vmem:[#allocation4 + $0x1e4] ss:$16 sps:$4 sm:$0xff]  }
  0x66   :  { %394 = vmatpush1.bf16.msra.mxu1 %v1506_v33  ;;  %843 = vmatpush1.bf16.msra.mxu0 %v1567_v60  ;;  %v1542_v33 = vld [vmem:[#allocation4 + $0x6c] ss:$16 sps:$4 sm:$0xff]  }
  0x67   :  { %395 = vmatprep.subr.bf16.mxu1 %v1507_v34  ;;  %844 = vmatprep.subr.bf16.mxu0 %v1575_v61  ;;  %v1540_v34 = vld [vmem:[#allocation4 + $0x68] ss:$16 sps:$4 sm:$0xff]   ;;  %v1614_v60 = vld [vmem:[#allocation4 + $0x1ec] ss:$16 sps:$4 sm:$0xff]   ;;  %v1609_v61 = vld [vmem:[#allocation4 + $0x1e0] ss:$16 sps:$4 sm:$0xff]  }
  0x6a   :  { %396 = vmatpush1.bf16.msra.mxu1 %v1509_v35  ;;  %845 = vmatpush1.bf16.msra.mxu0 %v1573_v62  ;;  %v1548_v35 = vld [vmem:[#allocation4 + $0x8c] ss:$16 sps:$4 sm:$0xff]   ;;  %v1612_v62 = vld [vmem:[#allocation4 + $0x1e8] ss:$16 sps:$4 sm:$0xff]  }
  0x6b   :  { %397 = vmatprep.subr.bf16.mxu1 %v1510_v36  ;;  %846 = vmatprep.subr.bf16.mxu0 %v1581_v63  ;;  %v1546_v36 = vld [vmem:[#allocation4 + $0x88] ss:$16 sps:$4 sm:$0xff]   ;;  %v1615_v63 = vld [vmem:[#allocation6 + $0x40] sm:$0xff]  }
  0x6e   :  { %398 = vmatpush1.bf16.msra.mxu1 %v1512_v37  ;;  %847 = vmatpush1.bf16.msra.mxu0 %v1579_v0  ;;  %v1554_v37 = vld [vmem:[#allocation4 + $0xac] ss:$16 sps:$4 sm:$0xff]   ;;  %v199_v0 = vld [vmem:[%s1866_s4] sm:$0x3] }
  0x6f   :  { %399 = vmatprep.subr.bf16.mxu1 %v1513_v38  ;;  %848 = vmatprep.subr.bf16.mxu0 %v1587_v1  ;;  %v1552_v38 = vld [vmem:[#allocation4 + $0xa8] ss:$16 sps:$4 sm:$0xff]   ;;  %v204_v1 = vrot.slane %v199_v0, %v1831_v9 }
  0x72   :  { %400 = vmatpush1.bf16.msra.mxu1 %v1515_v39  ;;  %849 = vmatpush1.bf16.msra.mxu0 %v1585_v2  ;;  %v1560_v39 = vld [vmem:[#allocation4 + $0xcc] ss:$16 sps:$4 sm:$0xff]   ;;  %v208_v2 = vrot.slane %v199_v0, %v1837_v11 }
  0x73   :  { %401 = vmatprep.subr.bf16.mxu1 %v1516_v40  ;;  %850 = vmatprep.subr.bf16.mxu0 %v1593_v3  ;;  %v1558_v40 = vld [vmem:[#allocation4 + $0xc8] ss:$16 sps:$4 sm:$0xff]  }
  0x76   :  { %402 = vmatpush1.bf16.msra.mxu1 %v1518_v41  ;;  %851 = vmatpush1.bf16.msra.mxu0 %v1591_v4  ;;  %v1566_v41 = vld [vmem:[#allocation4 + $0xec] ss:$16 sps:$4 sm:$0xff]  }
  0x77   :  { %869 = vmatprep.subr.bf16.mxu1 %v1524_v44  ;;  %852 = vmatprep.subr.bf16.mxu0 %v1599_v5  ;;  %v1570_v44 = vld [vmem:[#allocation4 + $0x108] ss:$16 sps:$4 sm:$0xff]  }
  0x7a   :  { %853 = vmatpush1.bf16.msra.mxu0 %v1597_v6 }
  0x7b   :  { %854 = vmatprep.subr.bf16.mxu0 %v1605_v55 }
  0x7e   :  { %855 = vmatpush1.bf16.msra.mxu0 %v1603_v57 }
  0x7f   :  { %856 = vmatprep.subr.bf16.mxu0 %v1611_v59 }
  0x82   :  { %857 = vmatpush1.bf16.msra.mxu0 %v1609_v61 }
  0x83   :  { %1412 = vmatprep.subr.bf16.mxu0 %v1615_v63 }
 0x113   :  { %v152_v14 = vpop.f32.mrb[0].mxu0 }
 0x114   :  { %v153_v15 = vadd.f32 %v152_v14, %v85_v12  ;;  %v154_v16 = vpop.f32.mrb[1].mxu0 }
 0x115   :  { %v155_v17 = vadd.f32 %v154_v16, %v89_v13  ;;  %v156_v18 = vpop.f32.mrb[2].mxu0 }
 0x116   :  { %v157_v19 = vadd.f32 %v156_v18, %v85_v12  ;;  %v158_v20 = vpop.f32.mrb[3].mxu0  ;;  %v161_v22 = vmax.f32 %v153_v15, 0.0 }
 0x117   :  { %v159_v21 = vadd.f32 %v158_v20, %v89_v13  ;;  %v162_v24 = vmax.f32 %v155_v17, 0.0  ;;  %v1616_v20 = vld [vmem:[#allocation6] sm:$0xff]  }
 0x118   :  { %v163_v23 = vmax.f32 %v157_v19, 0.0 }
 0x119   :  { %v164_v25 = vmax.f32 %v159_v21, 0.0  ;;  %v1617_v21 = vld [vmem:[#allocation6 + $0x48] sm:$0xff]  }
 0x11a   :  { %v165_v26 = vpack.c.bf16 %v163_v23, %v161_v22  ;;  %v1618_v22 = vld [vmem:[#allocation6 + $0x8] sm:$0xff]   ;;  %v1619_v23 = vld [vmem:[#allocation6 + $0x50] sm:$0xff]  }
 0x11b   :  { %v166_v27 = vpack.c.bf16 %v164_v25, %v162_v24  ;;  %v1620_v24 = vld [vmem:[#allocation6 + $0x10] sm:$0xff]   ;;  %v1621_v25 = vld [vmem:[#allocation6 + $0x58] sm:$0xff]  }
 0x11d   :  { %403 = vmatprep.mubr.bf16.mxu1 %v166_v27  ;;  %v1623_v27 = vld [vmem:[#allocation6 + $0x60] sm:$0xff]  }
 0x11e   :  { %404 = vmatmul.mubr.bf16.vlgmr.msra.gmra.mrb[0].mxu1 %v165_v26  ;;  %v1622_v26 = vld [vmem:[#allocation6 + $0x18] sm:$0xff]  }
 0x11f   :  { %870 = vmatpush1.bf16.msra.mxu1 %v1522_v28  ;;  %v1624_v28 = vld [vmem:[#allocation6 + $0x20] sm:$0xff]  }
 0x120   :  { %871 = vmatprep.subr.bf16.mxu1 %v1530_v29  ;;  %v1625_v29 = vld [vmem:[#allocation6 + $0x68] sm:$0xff]  }
 0x123   :  { %872 = vmatpush1.bf16.msra.mxu1 %v1528_v30  ;;  %v1626_v30 = vld [vmem:[#allocation6 + $0x28] sm:$0xff]  }
 0x124   :  { %873 = vmatprep.subr.bf16.mxu1 %v1536_v31  ;;  %v1627_v31 = vld [vmem:[#allocation6 + $0x70] sm:$0xff]  }
 0x127   :  { %874 = vmatpush1.bf16.msra.mxu1 %v1534_v32  ;;  %v1628_v32 = vld [vmem:[#allocation6 + $0x30] sm:$0xff]  }
 0x128   :  { %875 = vmatprep.subr.bf16.mxu1 %v1542_v33  ;;  %v1629_v33 = vld [vmem:[#allocation6 + $0x78] sm:$0xff]  }
 0x12b   :  { %876 = vmatpush1.bf16.msra.mxu1 %v1540_v34  ;;  %v1630_v34 = vld [vmem:[#allocation6 + $0x38] sm:$0xff]  }
 0x12c   :  { %877 = vmatprep.subr.bf16.mxu1 %v1548_v35  ;;  %v1631_v35 = vld [vmem:[#allocation6 + $0xc0] sm:$0xff]  }
 0x12f   :  { %878 = vmatpush1.bf16.msra.mxu1 %v1546_v36  ;;  %v496_v36 = vsub.s32 2, %v1828_v8 }
 0x130   :  { %879 = vmatprep.subr.bf16.mxu1 %v1554_v37  ;;  %v484_v37 = vld [vmem:[%s1868_s6] sm:$0xf] }
 0x133   :  { %880 = vmatpush1.bf16.msra.mxu1 %v1552_v38  ;;  %v500_v38 = vsub.s32 3, %v1828_v8 }
 0x134   :  { %881 = vmatprep.subr.bf16.mxu1 %v1560_v39  ;;  %v489_v39 = vrot.slane %v484_v37, %v1831_v9 }
 0x137   :  { %882 = vmatpush1.bf16.msra.mxu1 %v1558_v40  ;;  %v497_v40 = vrot.slane %v484_v37, %v496_v36 }
 0x138   :  { %883 = vmatprep.subr.bf16.mxu1 %v1566_v41  ;;  %v493_v41 = vrot.slane %v484_v37, %v1837_v11 }
 0x13b   :  { %884 = vmatpush1.bf16.msra.mxu1 %v1564_v42  ;;  %v501_v42 = vrot.slane %v484_v37, %v500_v38 }
 0x13c   :  { %885 = vmatprep.subr.bf16.mxu1 %v1572_v43 }
 0x13f   :  { %886 = vmatpush1.bf16.msra.mxu1 %v1570_v44 }
 0x140   :  { %887 = vmatprep.subr.bf16.mxu1 %v1578_v45 }
 0x143   :  { %888 = vmatpush1.bf16.msra.mxu1 %v1576_v46 }
 0x144   :  { %889 = vmatprep.subr.bf16.mxu1 %v1584_v47 }
 0x147   :  { %890 = vmatpush1.bf16.msra.mxu1 %v1582_v48 }
 0x148   :  { %891 = vmatprep.subr.bf16.mxu1 %v1590_v49 }
 0x14b   :  { %892 = vmatpush1.bf16.msra.mxu1 %v1588_v50 }
 0x14c   :  { %893 = vmatprep.subr.bf16.mxu1 %v1596_v51 }
 0x14f   :  { %894 = vmatpush1.bf16.msra.mxu1 %v1594_v52 }
 0x150   :  { %895 = vmatprep.subr.bf16.mxu1 %v1602_v53 }
 0x153   :  { %896 = vmatpush1.bf16.msra.mxu1 %v1600_v54 }
 0x154   :  { %897 = vmatprep.subr.bf16.mxu1 %v1608_v56 }
 0x157   :  { %898 = vmatpush1.bf16.msra.mxu1 %v1606_v58 }
 0x158   :  { %899 = vmatprep.subr.bf16.mxu1 %v1614_v60 }
 0x15b   :  { %900 = vmatpush1.bf16.msra.mxu1 %v1612_v62 }
 0x1f1   :  { %v405_v3 = vpop.f32.mrb[0].mxu1 }
 0x1f2   :  { %v406_v4 = vadd.f32 %v405_v3, %v204_v1  ;;  %v407_v5 = vpop.f32.mrb[1].mxu1 }
 0x1f3   :  { %v408_v6 = vadd.f32 %v407_v5, %v208_v2  ;;  %v409_v7 = vpop.f32.mrb[2].mxu1  ;;  %v1633_v5 = vld [vmem:[#allocation6 + $0xc8] sm:$0xff]  }
 0x1f4   :  { %v410_v10 = vadd.f32 %v409_v7, %v204_v1  ;;  %v411_v12 = vpop.f32.mrb[3].mxu1  ;;  %v414_v14 = vmax.f32 %v406_v4, 0.0  ;;  %v1632_v4 = vld [vmem:[#allocation6 + $0x80] sm:$0xff]   ;;  %v1635_v7 = vld [vmem:[#allocation6 + $0xd0] sm:$0xff]  }
 0x1f5   :  { %v412_v13 = vadd.f32 %v411_v12, %v208_v2  ;;  %v415_v16 = vmax.f32 %v408_v6, 0.0  ;;  %v1634_v6 = vld [vmem:[#allocation6 + $0x88] sm:$0xff]   ;;  %v1637_v12 = vld [vmem:[#allocation6 + $0xd8] sm:$0xff]  }
 0x1f6   :  { %v416_v15 = vmax.f32 %v410_v10, 0.0  ;;  %v1636_v10 = vld [vmem:[#allocation6 + $0x90] sm:$0xff]  }
 0x1f7   :  { %v417_v17 = vmax.f32 %v412_v13, 0.0  ;;  %v1638_v13 = vld [vmem:[#allocation6 + $0x98] sm:$0xff]  }
 0x1f8   :  { %v418_v18 = vpack.c.bf16 %v416_v15, %v414_v14  ;;  %v1639_v14 = vld [vmem:[#allocation6 + $0xe0] sm:$0xff]  }
 0x1f9   :  { %v419_v19 = vpack.c.bf16 %v417_v17, %v415_v16  ;;  %v1640_v15 = vld [vmem:[#allocation6 + $0xa0] sm:$0xff]   ;;  %v1641_v16 = vld [vmem:[#allocation6 + $0xe8] sm:$0xff]  }
 0x1fa   :  { %v1642_v17 = vld [vmem:[#allocation6 + $0xa8] sm:$0xff]  }
 0x1fb   :  { %858 = vmatprep.mubr.bf16.mxu0 %v419_v19  ;;  %901 = vmatprep.mubr.bf16.mxu1 %v419_v19  ;;  %v1644_v19 = vld [vmem:[#allocation6 + $0xb0] sm:$0xff]  }
 0x1fc   :  { %859 = vmatmul.mubr.bf16.vlgmr.msra.gmra.mrb[4].mxu0 %v418_v18  ;;  %902 = vmatmul.mubr.bf16.vlgmr.msra.gmra.mrb[4].mxu1 %v418_v18  ;;  %v1643_v18 = vld [vmem:[#allocation6 + $0xf0] sm:$0xff]  }
 0x1fd   :  { %1413 = vmatpush3.bf16.msra.mxu0 %v1616_v20  ;;  %v1645_v20 = vld [vmem:[#allocation6 + $0xf8] sm:$0xff]  }
 0x1fe   :  { %1414 = vmatprep.subr.bf16.mxu0 %v1617_v21  ;;  %v1646_v21 = vld [vmem:[#allocation6 + $0xb8] sm:$0xff]  }
 0x201   :  { %1415 = vmatpush3.bf16.msra.mxu0 %v1618_v22 }
 0x202   :  { %1416 = vmatprep.subr.bf16.mxu0 %v1619_v23 }
 0x205   :  { %1417 = vmatpush3.bf16.msra.mxu0 %v1620_v24 }
 0x206   :  { %1418 = vmatprep.subr.bf16.mxu0 %v1621_v25 }
 0x209   :  { %1419 = vmatpush3.bf16.msra.mxu0 %v1622_v26 }
 0x20a   :  { %1420 = vmatprep.subr.bf16.mxu0 %v1623_v27 }
 0x20d   :  { %1421 = vmatpush3.bf16.msra.mxu0 %v1624_v28  ;;  %v1379_v28 = vld [vmem:[%s1870_s8] ss:$0 sm:$0xff] }
 0x20e   :  { %1422 = vmatprep.subr.bf16.mxu0 %v1625_v29 }
 0x211   :  { %1423 = vmatpush3.bf16.msra.mxu0 %v1626_v30 }
 0x212   :  { %1424 = vmatprep.subr.bf16.mxu0 %v1627_v31 }
 0x215   :  { %1425 = vmatpush3.bf16.msra.mxu0 %v1628_v32 }
 0x216   :  { %1426 = vmatprep.subr.bf16.mxu0 %v1629_v33 }
 0x219   :  { %1427 = vmatpush3.bf16.msra.mxu0 %v1630_v34 }
 0x21a   :  { %1434 = vmatprep.subr.bf16.mxu0 %v1631_v35 }
 0x2cf   :  { %v860_v43 = vpop.f32.mrb[4].mxu0  ;;  %v903_v44 = vpop.f32.mrb[4].mxu1 }
 0x2d0   :  { %v861_v45 = vadd.f32 %v860_v43, %v489_v39  ;;  %v904_v46 = vadd.f32 %v903_v44, %v497_v40  ;;  %v862_v47 = vpop.f32.mrb[5].mxu0  ;;  %v905_v48 = vpop.f32.mrb[5].mxu1 }
 0x2d1   :  { %v863_v49 = vadd.f32 %v862_v47, %v493_v41  ;;  %v906_v50 = vadd.f32 %v905_v48, %v501_v42  ;;  %v864_v51 = vpop.f32.mrb[6].mxu0  ;;  %v907_v52 = vpop.f32.mrb[6].mxu1 }
 0x2d2   :  { %v865_v53 = vadd.f32 %v864_v51, %v489_v39  ;;  %v908_v54 = vadd.f32 %v907_v52, %v497_v40  ;;  %v866_v55 = vpop.f32.mrb[7].mxu0  ;;  %v909_v8 = vpop.f32.mrb[7].mxu1  ;;  %v912_v57 = vmax.f32 %v861_v45, 0.0  ;;  %v914_v58 = vmax.f32 %v904_v46, 0.0 }
 0x2d3   :  { %v867_v56 = vadd.f32 %v866_v55, %v493_v41  ;;  %v910_v9 = vadd.f32 %v909_v8, %v501_v42  ;;  %v913_v60 = vmax.f32 %v863_v49, 0.0  ;;  %v915_v61 = vmax.f32 %v906_v50, 0.0 }
 0x2d4   :  { %v916_v11 = vmax.f32 %v865_v53, 0.0  ;;  %v918_v59 = vmax.f32 %v908_v54, 0.0 }
 0x2d5   :  { %v917_v62 = vmax.f32 %v867_v56, 0.0  ;;  %v919_v63 = vmax.f32 %v910_v9, 0.0 }
 0x2d6   :  { %v920_v0 = vpack.c.bf16 %v916_v11, %v912_v57  ;;  %v922_v1 = vpack.c.bf16 %v918_v59, %v914_v58 }
 0x2d7   :  { %v921_v2 = vpack.c.bf16 %v917_v62, %v913_v60  ;;  %v923_v3 = vpack.c.bf16 %v919_v63, %v915_v61 }
 0x2d9   :  { %1219 = vmatprep.mubr.bf16.mxu0 %v921_v2 }
 0x2da   :  { %1220 = vmatmul.mubr.bf16.vlgmr.msra.gmra.mrb[8].mxu0 %v920_v0 }
 0x2db   :  { %1435 = vmatpush3.bf16.msra.mxu0 %v1632_v4  ;;  %1260 = vmatprep.mubr.bf16.mxu0 %v923_v3 }
 0x2dc   :  { %1436 = vmatprep.subr.bf16.mxu0 %v1633_v5 }
 0x2df   :  { %1437 = vmatpush3.bf16.msra.mxu0 %v1634_v6 }
 0x2e0   :  { %1438 = vmatprep.subr.bf16.mxu0 %v1635_v7 }
 0x2e3   :  { %1439 = vmatpush3.bf16.msra.mxu0 %v1636_v10 }
 0x2e4   :  { %1440 = vmatprep.subr.bf16.mxu0 %v1637_v12 }
 0x2e7   :  { %1441 = vmatpush3.bf16.msra.mxu0 %v1638_v13 }
 0x2e8   :  { %1442 = vmatprep.subr.bf16.mxu0 %v1639_v14 }
 0x2eb   :  { %1443 = vmatpush3.bf16.msra.mxu0 %v1640_v15 }
 0x2ec   :  { %1444 = vmatprep.subr.bf16.mxu0 %v1641_v16 }
 0x2ef   :  { %1445 = vmatpush3.bf16.msra.mxu0 %v1642_v17 }
 0x2f0   :  { %1446 = vmatprep.subr.bf16.mxu0 %v1643_v18 }
 0x2f3   :  { %1447 = vmatpush3.bf16.msra.mxu0 %v1644_v19 }
 0x2f4   :  { %1448 = vmatprep.subr.bf16.mxu0 %v1645_v20 }
 0x2f7   :  { %1449 = vmatpush3.bf16.msra.mxu0 %v1646_v21 }
 0x2fa   :  { %1261 = vmatmul.mubr.bf16.vlgmr.msra.gmra.mrb[12].mxu0 %v922_v1 }
 0x3ad   :  { %v1428_v22 = vpop.f32.mrb[8].mxu0 }
 0x3ae   :  { %v1429_v23 = vpop.f32.mrb[9].mxu0 }
 0x3af   :  { %v1430_v24 = vadd.f32 %v1429_v23, %v1428_v22  ;;  %v1431_v25 = vpop.f32.mrb[10].mxu0 }
 0x3b0   :  { %v1432_v26 = vpop.f32.mrb[11].mxu0 }
 0x3b1   :  { %v1433_v27 = vadd.f32 %v1432_v26, %v1431_v25  ;;  %v1222_v31 = vadd.f32 %v1430_v24, %v1379_v28 }
 0x3b3   :  { %v1225_v35 = vadd.f32 %v1433_v27, %v1379_v28 }
 0x3cd   :  { %v1450_v29 = vpop.f32.mrb[12].mxu0 }
 0x3ce   :  { %v1451_v30 = vpop.f32.mrb[13].mxu0 }
 0x3cf   :  { %v1452_v32 = vadd.f32 %v1451_v30, %v1450_v29  ;;  %v1453_v33 = vpop.f32.mrb[14].mxu0 }
 0x3d0   :  { %v1454_v34 = vpop.f32.mrb[15].mxu0 }
 0x3d1   :  { %v1263_v36 = vadd.f32 %v1452_v32, %v1222_v31  ;;  %v1455_v37 = vadd.f32 %v1454_v34, %v1453_v33 }
 0x3d3   :  { %1269 = vst [vmem:[%s1871_s9] sm:$0xff] %v1263_v36  ;;  %v1266_v38 = vadd.f32 %v1455_v37, %v1225_v35 }
 0x3d5   :  { %1270 = vst [vmem:[%s1871_s9 + $0x8] sm:$0xff] %v1266_v38 }
 0x3d6   :  { %1275 = vsyncpa [#allocation3], 1 }
 0x3d7   :  { %1276 = vsyncpa [#allocation5], 1 }

</bundles_post_ra>
